<compile_context>
chip_gen: v5e
topology: v5e:2x2
jax: 0.10.0
libtpu: 0.0.40
codegen_flags: <defaults>
</compile_context>

<pallas_src>
import functools

import jax
import jax.numpy as jnp
from jax.experimental import pallas as pl
from jax.experimental.pallas import tpu as pltpu


def _dense_bce_sum_kernel(x_ref, acc_ref, *, off_value, n_rows, tm,
                          blocks_per_core, need_mask):
    c = pl.program_id(0)          # "core" axis (parallel)
    i = pl.program_id(1)          # row-block axis (arbitrary / reduction)

    @pl.when(i == 0)
    def _():
        acc_ref[...] = jnp.zeros_like(acc_ref)

    x = x_ref[...].astype(jnp.float32)                          # (tm, C)
    # Label-free part of smoothed-target BCE-with-logits:
    #   max(x, 0) - off*x + log1p(exp(-|x|))
    # TODO(synk): optional v6e/v7x bf16-native elementwise path (keep exp/log1p
    # and the accumulation in f32) if the VPU slot ever binds here.
    loss = (jnp.maximum(x, 0.0) - jnp.float32(off_value) * x
            + jnp.log1p(jnp.exp(-jnp.abs(x))))

    def _accumulate(vals):
        # Vreg-shaped fold: (tm, C) -> (8, C). Sublane-group split only (no
        # data movement across (8,128) tiles); the adds are pure VPU work.
        acc_ref[...] += vals.reshape(tm // 8, 8, vals.shape[-1]).sum(axis=0)

    if need_mask:
        # Only tail blocks pay the mask; full blocks take the cheap path.
        row_start = (c * blocks_per_core + i) * tm              # logical row
        is_full = row_start + tm <= n_rows

        @pl.when(is_full)
        def _():
            _accumulate(loss)

        @pl.when(jnp.logical_not(is_full))
        def _():
            # Padded rows contain unspecified data (may be Inf/NaN after
            # exp/log1p): remove them with a select, NOT a multiply.
            rid = jax.lax.broadcasted_iota(jnp.int32, (tm, 1), 0) + row_start
            _accumulate(jnp.where(rid < n_rows, loss, 0.0))
    else:
        _accumulate(loss)


def _round_up(v, m):
    return ((v + m - 1) // m) * m


def _vmem_capacity_bytes():
    try:
        info = pltpu.get_tpu_info()
        cap = getattr(info, "vmem_capacity_bytes", None)
        if cap:
            return int(cap)
    except Exception:
        pass
    return 64 * 1024 * 1024        # conservative (v7x-sized) fallback


def _choose_tm(n_rows, n_cls, itemsize, vmem_ceiling):
    """Row tile: ~8 MiB of (lane-padded) logits per block, multiple of 16 rows."""
    lane_c = _round_up(max(n_cls, 1), 128)
    target_bytes = min(8 * 1024 * 1024, vmem_ceiling // 4)
    tm = target_bytes // max(1, lane_c * itemsize)
    tm = max(16, min(32768, (tm // 16) * 16))
    padded_n = _round_up(max(n_rows, 1), 16)
    return min(tm, max(16, padded_n))


def dense_binary_cross_entropy(x, target, smoothing=0.1, tm=None, num_cores=2):
    """x: (N, C) float logits; target: (N,) integer class labels."""
    N, C = x.shape
    off_value = smoothing / C
    on_value = 1.0 - smoothing + off_value
    labels = target.astype(jnp.int32).reshape(N, 1)

    itemsize = jnp.dtype(x.dtype).itemsize
    lane_c = _round_up(C, 128)

    # Generation-aware scoped-VMEM ceiling: ~40 MiB on 64 MiB parts (v7x),
    # up to 64 MiB on 128 MiB parts (v5e/v6e).
    vmem_cap = _vmem_capacity_bytes()
    vmem_ceiling = min((vmem_cap * 5) // 8, 64 * 1024 * 1024)

    if tm is None:
        tm = _choose_tm(N, C, itemsize, vmem_ceiling)
    assert tm % 8 == 0, "tm must be a multiple of 8 (16 recommended for bf16)"

    n_row_blocks = pl.cdiv(N, tm)                    # blocks touching real rows
    blocks_per_core = pl.cdiv(n_row_blocks, num_cores)
    total_blocks = num_cores * blocks_per_core
    need_mask = (total_blocks * tm) != N
    max_block = max(n_row_blocks - 1, 0)             # keep DMA windows in-range

    kernel = functools.partial(
        _dense_bce_sum_kernel,
        off_value=off_value, n_rows=N, tm=tm,
        blocks_per_core=blocks_per_core, need_mask=need_mask)

    def x_index_map(c, i):
        g = c * blocks_per_core + i
        # Fully-padded trailing blocks re-read the last valid window; their
        # contribution is masked to zero inside the kernel by logical row id.
        return (jnp.minimum(g, max_block), 0)

    # Honest VMEM accounting (lane-padded footprints, double-buffered input).
    x_block_bytes = tm * lane_c * itemsize
    out_bytes = num_cores * 8 * lane_c * 4
    needed = 2 * x_block_bytes + 2 * out_bytes + (4 << 20)
    vmem_limit = int(min(max(2 * needed, 32 * 1024 * 1024), vmem_ceiling))

    cost = pl.CostEstimate(
        flops=7 * N * C,
        transcendentals=2 * N * C,
        bytes_accessed=N * C * itemsize + num_cores * 8 * lane_c * 4,
    )

    # Per-core partial sums live in an (8, C) output block per core: the block
    # index only changes along the parallel "core" axis, so along the reduction
    # axis it stays resident in VMEM (accumulator pattern).
    partials = pl.pallas_call(
        kernel,
        out_shape=jax.ShapeDtypeStruct((num_cores * 8, C), jnp.float32),
        grid_spec=pltpu.PrefetchScalarGridSpec(
            num_scalar_prefetch=0,
            grid=(num_cores, blocks_per_core),
            in_specs=[pl.BlockSpec((tm, C), x_index_map)],
            out_specs=pl.BlockSpec((8, C), lambda c, i: (c, 0)),
        ),
        compiler_params=pltpu.CompilerParams(
            dimension_semantics=("parallel", "arbitrary"),
            vmem_limit_bytes=vmem_limit,
        ),
        cost_estimate=cost,
    )(x)

    # Label-dependent correction term: (on - off) * sum_n x[n, label[n]].
    # An N-element gather -> negligible HBM traffic; plain XLA in the wrapper.
    gathered = jnp.take_along_axis(x, labels, axis=1).astype(jnp.float32)
    total = partials.sum() - jnp.float32(on_value - off_value) * gathered.sum()
    return (total / jnp.float32(N * C)).astype(x.dtype)


def _reference(x, target, smoothing=0.1):
    N, C = x.shape
    off = smoothing / C
    on = 1.0 - smoothing + off
    xf = x.astype(jnp.float32)
    tgt = jnp.full((N, C), off, jnp.float32).at[jnp.arange(N), target].set(on)
    loss = jnp.maximum(xf, 0.0) - xf * tgt + jnp.log1p(jnp.exp(-jnp.abs(xf)))
    return jnp.mean(loss)


if __name__ == "__main__":
    key = jax.random.PRNGKey(0)

    # Case 1: small aligned shape, auto tile choice (single block per core).
    kx, kt = jax.random.split(key)
    N, C = 16, 128
    x = jax.random.normal(kx, (N, C), dtype=jnp.float32) * 2.0
    target = jax.random.randint(kt, (N,), 0, C, dtype=jnp.int32)
    loss = jax.block_until_ready(dense_binary_cross_entropy(x, target, smoothing=0.1))
    ref = _reference(x, target, smoothing=0.1)
    assert jnp.allclose(loss, ref, rtol=1e-5, atol=1e-5), (loss, ref)

    # Case 2: N not divisible by the tile -> multi-block reduction per core,
    # predicated tail masking, fully-padded trailing block on the second core.
    kx2, kt2 = jax.random.split(kt)
    N2, C2 = 40, 128
    x2 = jax.random.normal(kx2, (N2, C2), dtype=jnp.float32) * 2.0
    target2 = jax.random.randint(kt2, (N2,), 0, C2, dtype=jnp.int32)
    loss2 = jax.block_until_ready(
        dense_binary_cross_entropy(x2, target2, smoothing=0.1, tm=16))
    ref2 = _reference(x2, target2, smoothing=0.1)
    assert jnp.allclose(loss2, ref2, rtol=1e-5, atol=1e-5), (loss2, ref2)

    print("KERNEL_OK")
</pallas_src>

<mosaic_0001>
module attributes {stable_mosaic.version = 11 : i64} {
  func.func @_dense_bce_sum_kernel(%arg0: i32, %arg1: i32, %arg2: memref<16x128xf32, #tpu.memory_space<vmem>>, %arg3: memref<8x128xf32, #tpu.memory_space<vmem>>) attributes {dimension_semantics = [#tpu.dimension_semantics<parallel>, #tpu.dimension_semantics<arbitrary>], iteration_bounds = array<i64: 2, 1>, scalar_prefetch = 0 : i64, scratch_operands = 0 : i64, tpu.core_type = #tpu.core_type<tc>, window_params = [{transform_indices = @transform_0, window_bounds = array<i64: 16, 128>}, {transform_indices = @transform_1, window_bounds = array<i64: 8, 128>}]} {
    %c0_i32 = arith.constant 0 : i32
    %0 = arith.cmpi eq, %arg1, %c0_i32 : i32
    %1 = arith.extui %0 : i1 to i32
    %c0_i32_0 = arith.constant 0 : i32
    %2 = arith.cmpi ne, %1, %c0_i32_0 : i32
    scf.if %2 {
      %cst_8 = arith.constant 0.000000e+00 : f32
      %25 = vector.broadcast %cst_8 : f32 to vector<8x128xf32>
      %c0_9 = arith.constant 0 : index
      %c0_10 = arith.constant 0 : index
      %26 = vector.load %arg3[%c0_9, %c0_10] : memref<8x128xf32, #tpu.memory_space<vmem>>, vector<8x128xf32>
      tpu.vector_store %arg3[%c0_9, %c0_10], %25 {strides = array<i32>} : memref<8x128xf32, #tpu.memory_space<vmem>>, vector<8x128xf32>,
    } else {
    }
    %c0 = arith.constant 0 : index
    %c0_1 = arith.constant 0 : index
    %3 = vector.load %arg2[%c0, %c0_1] : memref<16x128xf32, #tpu.memory_space<vmem>>, vector<16x128xf32>
    %cst = arith.constant 0.000000e+00 : f32
    %4 = vector.broadcast %cst : f32 to vector<16x128xf32>
    %5 = arith.maximumf %3, %4 : vector<16x128xf32>
    %cst_2 = arith.constant 7.812500e-04 : f32
    %6 = vector.broadcast %cst_2 : f32 to vector<16x128xf32>
    %7 = arith.mulf %6, %3 : vector<16x128xf32>
    %8 = arith.subf %5, %7 : vector<16x128xf32>
    %9 = math.absf %3 : vector<16x128xf32>
    %cst_3 = arith.constant 0.000000e+00 : f32
    %10 = vector.broadcast %cst_3 : f32 to vector<16x128xf32>
    %11 = arith.subf %10, %9 : vector<16x128xf32>
    %12 = math.exp %11 : vector<16x128xf32>
    %13 = math.log1p %12 : vector<16x128xf32>
    %14 = arith.addf %8, %13 : vector<16x128xf32>
    %c1_i32 = arith.constant 1 : i32
    %15 = arith.muli %arg0, %c1_i32 : i32
    %16 = arith.addi %15, %arg1 : i32
    %c16_i32 = arith.constant 16 : i32
    %17 = arith.muli %16, %c16_i32 : i32
    %c16_i32_4 = arith.constant 16 : i32
    %18 = arith.addi %17, %c16_i32_4 : i32
    %c16_i32_5 = arith.constant 16 : i32
    %19 = arith.cmpi sle, %18, %c16_i32_5 : i32
    %20 = arith.extui %19 : i1 to i32
    %c0_i32_6 = arith.constant 0 : i32
    %21 = arith.cmpi ne, %20, %c0_i32_6 : i32
    scf.if %21 {
      %c0_8 = arith.constant 0 : index
      %c0_9 = arith.constant 0 : index
      %25 = vector.load %arg3[%c0_8, %c0_9] : memref<8x128xf32, #tpu.memory_space<vmem>>, vector<8x128xf32>
      %26 = vector.shape_cast %14 : vector<16x128xf32> to vector<2x8x128xf32>
      %cst_10 = arith.constant dense<0.000000e+00> : vector<8x128xf32>
      %27 = vector.multi_reduction <add>, %26, %cst_10 [0] : vector<2x8x128xf32> to vector<8x128xf32>
      %28 = arith.addf %25, %27 : vector<8x128xf32>
      %c0_11 = arith.constant 0 : index
      %c0_12 = arith.constant 0 : index
      %29 = vector.load %arg3[%c0_11, %c0_12] : memref<8x128xf32, #tpu.memory_space<vmem>>, vector<8x128xf32>
      tpu.vector_store %arg3[%c0_11, %c0_12], %28 {strides = array<i32>} : memref<8x128xf32, #tpu.memory_space<vmem>>, vector<8x128xf32>,
    } else {
    }
    %true = arith.constant true
    %22 = arith.xori %19, %true : i1
    %23 = arith.extui %22 : i1 to i32
    %c0_i32_7 = arith.constant 0 : i32
    %24 = arith.cmpi ne, %23, %c0_i32_7 : i32
    scf.if %24 {
      %25 = tpu.iota {dimensions = array<i32: 0>} : vector<16x1xi32>
      %26 = vector.broadcast %17 : i32 to vector<16x1xi32>
      %27 = arith.addi %25, %26 : vector<16x1xi32>
      %c16_i32_8 = arith.constant 16 : i32
      %28 = vector.broadcast %c16_i32_8 : i32 to vector<16x1xi32>
      %29 = arith.cmpi slt, %27, %28 : vector<16x1xi32>
      %cst_9 = arith.constant 0.000000e+00 : f32
      %30 = vector.shape_cast %29 : vector<16x1xi1> to vector<16x1xi1>
      %31 = vector.broadcast %30 : vector<16x1xi1> to vector<16x128xi1>
      %32 = vector.broadcast %cst_9 : f32 to vector<16x128xf32>
      %33 = arith.select %31, %14, %32 : vector<16x128xi1>, vector<16x128xf32>
      %c0_10 = arith.constant 0 : index
      %c0_11 = arith.constant 0 : index
      %34 = vector.load %arg3[%c0_10, %c0_11] : memref<8x128xf32, #tpu.memory_space<vmem>>, vector<8x128xf32>
      %35 = vector.shape_cast %33 : vector<16x128xf32> to vector<2x8x128xf32>
      %cst_12 = arith.constant dense<0.000000e+00> : vector<8x128xf32>
      %36 = vector.multi_reduction <add>, %35, %cst_12 [0] : vector<2x8x128xf32> to vector<8x128xf32>
      %37 = arith.addf %34, %36 : vector<8x128xf32>
      %c0_13 = arith.constant 0 : index
      %c0_14 = arith.constant 0 : index
      %38 = vector.load %arg3[%c0_13, %c0_14] : memref<8x128xf32, #tpu.memory_space<vmem>>, vector<8x128xf32>
      tpu.vector_store %arg3[%c0_13, %c0_14], %37 {strides = array<i32>} : memref<8x128xf32, #tpu.memory_space<vmem>>, vector<8x128xf32>,
    } else {
    }
    return
  }
  func.func @transform_0(%arg0: i32, %arg1: i32) -> (i32, i32) {
    %c1_i32 = arith.constant 1 : i32
    %0 = arith.muli %arg0, %c1_i32 : i32
    %1 = arith.addi %0, %arg1 : i32
    %c0_i32 = arith.constant 0 : i32
    %2 = arith.minsi %1, %c0_i32 : i32
    %c0_i32_0 = arith.constant 0 : i32
    %c0_i32_1 = arith.constant 0 : i32
    return %2, %c0_i32_0 : i32, i32
  }
  func.func @transform_1(%arg0: i32, %arg1: i32) -> (i32, i32) {
    %c0_i32 = arith.constant 0 : i32
    %c0_i32_0 = arith.constant 0 : i32
    return %arg0, %c0_i32 : i32, i32
  }
}

</mosaic_0001>

<bundles_post_ra>
// kernel: tpu_custom_call.1
= control target key start
LH: loop header
LB: loop body
LE: loop exit
PB: predicated region body
PF: predicated region fallthrough
CT: control target
= control target key end

     0   :  { %6 = vsyncpa [#allocation3], 0  ;;  %s759_s0 = inlined_call_operand.hbm [shape: f32[16,128], index: 0, kind: input, shape index: {}]   ;;  %s760_s1 = inlined_call_operand.hbm [shape: f32[16,128], index: 1, kind: output, shape index: {}]  }
   0x1   :  { %8 = vsyncpa [#allocation3 + $0x1], 0 }
   0x2   :  { %9 = vsyncpa [#allocation4], 0 }
   0x3   :  { %11 = vsyncpa [#allocation4 + $0x1], 0  ;;  %s594_s6 = smov 0   ;;  %s596_s7 = smov 0  }
   0x4   :  { %s598_s8 = smov 0   ;;  %s600_s9 = smov 0  }
   0x5   :  { %s602_s10 = smov 0   ;;  %s604_s11 = smov 0  }
   0x6   :  { %s606_s12 = smov 0   ;;  %s608_s13 = smov 0  }
   0x7 LB: > { %s330_s14 = sadd.s32 4294967295, %s578_s13   ;;  %s331_s15 = sadd.s32 4294967294, %s578_s13   ;;  %s578_s13 = sphi %s608_s13, %s17_s13   ;;  %s574_s12 = sphi %s606_s12, %s771_s12   ;;  %s570_s11 = sphi %s604_s11, %s770_s11   ;;  %s566_s10 = sphi %s602_s10, %s749_s10   ;;  %s562_s9 = sphi %s600_s9, %s769_s9   ;;  %s558_s8 = sphi %s598_s8, %s768_s8   ;;  %s554_s7 = sphi %s596_s7, %s767_s7   ;;  %s550_s6 = sphi %s594_s6, %s766_s6  }
   0x8   : > { %s29_s16 = sadd.s32 1, %s574_s12  ;;  %p547_p1 = scmp.ne.s32.totalorder %s566_s10, 0 }
   0x9   : > { %p31_p0 = scmp.ge.s32.totalorder %s29_s16, 2  ;;  %p50_p2 = scmp.eq.s32.totalorder %s578_s13, 0 }
   0xa   : > { %p55_p3 = scmp.ne.s32.totalorder %s566_s10, %s562_s9  ;;  %p56_p5 = scmp.eq.s32.totalorder %s330_s14, 0 }
   0xb   : > { %s773_s16 = smov (%p31_p0, %s29_s16), 0  ;;  %p640_p4 = por %p547_p1, %p50_p2 }
   0xc   : > { %p644_p6 = por %p56_p5, %p55_p3  ;;  %s65_s19 = ssub.s32 %s574_s12, %s773_s16 }
   0xd   : > { %p66_p7 = scmp.eq.s32.totalorder %s65_s19, 0  ;;  %s68_s20 = sadd.s32 1, %s558_s8 }
   0xe   : > { %p78_p8 = scmp.ne.s32.totalorder %s558_s8, %s554_s7  ;;  %p79_p9 = scmp.eq.s32.totalorder %s330_s14, 1 }
   0xf   : > { %s652_s21 = scalar_select %p66_p7, %s558_s8, %s68_s20  }
  0x10   : > { %p84_p10 = scmp.ne.s32.totalorder %s554_s7, %s550_s6  ;;  %p85_p11 = scmp.eq.s32.totalorder %s331_s15, 1 }
  0x11   : > { %p658_p12 = por %p79_p9, %p78_p8  ;;  %p333_p13 = scmp.ge.s32.totalorder %s578_s13, 2 }
  0x12   : > { %p663_p0 = por %p85_p11, %p84_p10  ;;  %p360_p1 = scmp.lt.s32.totalorder %s578_s13, 2 }
  0x13   : > { %s118_s26 = sshll.u32 %s759_s0, 4  ;;  %s580_s27 = smov [#allocation2]   ;;  %s119_s26 = int_to_ptr.hbm [resolvable:$true] %s118_s26 }
  0x14   : > { %s120_s28 = sshll.u32 %s580_s27, 4  ;;  %p673_p2 = pnand %p360_p1, %p640_p4  ;;  %s121_s28 = int_to_ptr.vmem [resolvable:$true] %s120_s28 }
  0x15   : > { %p337_p3 = scmp.ge.s32.totalorder %s578_s13, 1  ;;  %p128_p5 = scmp.lt.s32.totalorder %s578_s13, 3 }
  0x16   : > { %s445_s30 = sshra.s32 %s119_s26, 4  ;;  %p449_p8 = pneg %p673_p2  ;;  %s446_s30 = int_to_ptr.hbm [resolvable:$true] %s445_s30 }
  0x17   : > { %s447_s2 = scalar_lea.hbm %s446_s30, 16  ;;  %s452_s5 = scalar_lea.hbm %s759_s0, 16 }
  0x18   : > { %p448_p7 = scmp.ne.s32.totalorder %s446_s30, %s447_s2  ;;  %p454_p11 = scmp.lt.s32.totalorder %s452_s5, %s447_s2 }
  0x1a   : > { %p450_p9 = pnand %p449_p8, %p448_p7 }
  0x1c   : > { %p451_p10 = pneg %p450_p9 }
  0x1e   : > { %p456_p4 = pnand %p454_p11, %p451_p10 }
  0x20   : > { %459 = shalt.err (!%p456_p4)
}
  0x21   : > { %s581_s9 = smov 128   ;;  %s582_s14 = smov 8  }
  0x22   : > { %355 = dma.hbm_to_vmem [thread:$0]  (!%p673_p2), %s119_s26, 256, %s121_s28, [#allocation3], %s581_s9, %s581_s9, %s582_s14  }
  0x23   : > { %p129_p1 = pnand %p337_p3, %p128_p5 }
  0x24   : > { %s134_s15 = sand.u32 (!%p129_p1), 1, %s566_s10  }
  0x25   : > { %132 = sbr.rel (%p129_p1) target bundleno = 114 (0x72), region = 24  ;;  %s338_s17 = sshll.u32 (!%p129_p1), %s134_s15, 4 }
  0x26   : > { %s135_s19 = scalar_lea.sflag (!%p129_p1), [#allocation3], %s134_s15  ;;  %s138_s20 = scalar_lea.vmem (!%p129_p1), [#allocation2], %s338_s17 }
  0x2a   : > { %540 = dma.done.wait (%p644_p6), %s135_s19, 256  }
  0x2b   : > { %542 = vsyncadd (%p644_p6), %s135_s19, 4294967040  ;;  %s155_s24 = sand.u32 1, %s554_s7   ;;  %s340_s25 = sshll.u32 %s570_s11, 4  ;;  %v583_v0 = vmov 0.0   ;;  %v167_v1 = vld [vmem:[%s138_s20] sm:$0xff]  ;;  %v168_v2 = vld [vmem:[%s138_s20 + $0x8] sm:$0xff] }
  0x2c   : > { %s339_s26 = sshll.u32 %s155_s24, 3  ;;  %s701_s27 = sadd.s32 16, %s340_s25  ;;  %v175_v3 = vand.u32 2147483647, %v167_v1  ;;  %v176_v4 = vand.u32 2147483647, %v168_v2 }
  0x2d   : > { %s703_s28 = scalar_lea.vmem [#allocation5], %s339_s26  ;;  %v169_v16 = vmax.f32 %v167_v1, 0.0  ;;  %v171_v17 = vmul.f32 0.00078125, %v167_v1  ;;  %v170_v20 = vmax.f32 %v168_v2, 0.0  ;;  %p341_p6 = scmp.gt.s32.totalorder %s701_s27, 16 }
  0x2e   : > { %166 = vst [vmem:[%s703_s28] sm:$0xff] %v583_v0  ;;  %v177_v5 = vsub.f32 0.0, %v175_v3  ;;  %v178_v6 = vsub.f32 0.0, %v176_v4  ;;  %v172_v21 = vmul.f32 0.00078125, %v168_v2 }
  0x2f   : > { %v173_v25 = vsub.f32 %v169_v16, %v171_v17 }
  0x30   : > { %v179_v7 = vmul.f32 1.442695, %v177_v5  ;;  %v181_v8 = vmul.f32 1.442695, %v178_v6  ;;  %v174_v28 = vsub.f32 %v170_v20, %v172_v21 }
  0x32   : > { %437 = vpow2.f32 %v179_v7 }
  0x33   : > { %439 = vpow2.f32 %v181_v8 }
  0x38   : > { %v438_v9 = vpop.eup %437 }
  0x39   : > { %v440_v10 = vpop.eup %439  ;;  %v183_v11 = vadd.f32 1.0, %v438_v9  ;;  %v186_v12 = vmul.f32 -0.5, %v438_v9  ;;  %v189_v18 = vand.u32 2147483647, %v438_v9 }
  0x3a   : > { %v192_v13 = vadd.f32 1.0, %v440_v10  ;;  %v195_v14 = vmul.f32 -0.5, %v440_v10  ;;  %v198_v22 = vand.u32 2147483647, %v440_v10 }
  0x3b   : > { %441 = vlog2.f32 %v183_v11  ;;  %v187_v15 = vadd.f32 1.0, %v186_v12  ;;  %vm190_vm0 = vcmp.lt.f32.partialorder %v189_v18, 0.0004427343 }
  0x3c   : > { %443 = vlog2.f32 %v192_v13  ;;  %v196_v19 = vadd.f32 1.0, %v195_v14  ;;  %vm199_vm1 = vcmp.lt.f32.partialorder %v198_v22, 0.0004427343 }
  0x3d   : > { %v188_v23 = vmul.f32 %v438_v9, %v187_v15 }
  0x3e   : > { %v197_v26 = vmul.f32 %v440_v10, %v196_v19 }
  0x41   : > { %v442_v24 = vpop.eup %441 }
  0x42   : > { %v444_v27 = vpop.eup %443  ;;  %v185_v29 = vmul.f32 0.6931472, %v442_v24  ;;  %209 = sbr.rel (%p341_p6) target bundleno = 77 (0x4d), region = 36 }
  0x43   : > { %v194_v30 = vmul.f32 0.6931472, %v444_v27 }
  0x44   : > { %v191_v31 = vsel %vm190_vm0, %v188_v23, %v185_v29 }
  0x45   : > { %v200_v32 = vsel %vm199_vm1, %v197_v26, %v194_v30  ;;  %v201_v33 = vadd.f32 %v191_v31, %v173_v25 }
  0x46   : > { %v202_v34 = vadd.f32 %v200_v32, %v174_v28 }
  0x47   : > { %v210_v35 = vld [vmem:[%s703_s28] sm:$0xff] }
  0x48   : > { %v211_v36 = vadd.f32 %v202_v34, %v201_v33 }
  0x4a   : > { %v212_v37 = vadd.f32 %v211_v36, %v210_v35 }
  0x4c   : > { %213 = vst [vmem:[%s703_s28] sm:$0xff] %v212_v37 }
  0x4d PF: > { %p342_p2 = scmp.le.s32.totalorder %s701_s27, 16 }
  0x4f   : > { %217 = sbr.rel (%p342_p2) target bundleno = 99 (0x63), region = 40 }
  0x54   : > { %v218_v38 = vlaneseq  ;;  %v221_v39 = vstv %s340_s25  ;;  %v232_v46 = vld [vmem:[%s703_s28] sm:$0xff] }
  0x56   : > { %v219_v40 = vshrl.u32 %v218_v38, 7 }
  0x58   : > { %v220_v41 = vadd.s32 8, %v219_v40  ;;  %v222_v42 = vadd.s32 %v221_v39, %v219_v40 }
  0x5a   : > { %v223_v43 = vadd.s32 %v221_v39, %v220_v41  ;;  %vm224_vm2 = vcmp.lt.s32.totalorder %v222_v42, 16 }
  0x5b   : > { %v230_v44 = vsel %vm224_vm2, %v201_v33, 0.0 }
  0x5c   : > { %vm225_vm3 = vcmp.lt.s32.totalorder %v223_v43, 16 }
  0x5d   : > { %v231_v45 = vsel %vm225_vm3, %v202_v34, 0.0 }
  0x5e   : > { %v233_v47 = vadd.f32 %v231_v45, %v230_v44 }
  0x60   : > { %v234_v48 = vadd.f32 %v233_v47, %v232_v46 }
  0x62   : > { %235 = vst [vmem:[%s703_s28] sm:$0xff] %v234_v48 }
  0x63 PF: > { %s344_s18 = sshll.u32 %s570_s11, 3  ;;  %s249_s3 = sshll.u32 %s703_s28, 4  ;;  %s250_s3 = int_to_ptr.vmem [resolvable:$true] %s249_s3 }
  0x64   : > { %s247_s2 = scalar_lea.hbm %s760_s1, %s344_s18  ;;  %s237_s5 = scalar_lea.sflag [#allocation4], %s155_s24 }
  0x65   : > { %s251_s4 = sshll.u32 %s247_s2, 4  ;;  %s495_s11 = scalar_lea.hbm %s760_s1, 16  ;;  %s252_s4 = int_to_ptr.hbm [resolvable:$true] %s251_s4 }
  0x66   : > { %s489_s9 = sshra.s32 %s252_s4, 4  ;;  %s490_s9 = int_to_ptr.hbm [resolvable:$true] %s489_s9 }
  0x67   : > { %s491_s14 = scalar_lea.hbm %s490_s9, 8  ;;  %p496_p8 = scmp.lt.s32.totalorder %s490_s9, %s760_s1 }
  0x68   : > { %p492_p3 = scmp.ne.s32.totalorder %s490_s9, %s491_s14  ;;  %p497_p9 = scmp.lt.s32.totalorder %s495_s11, %s491_s14 }
  0x6a   : > { %p493_p5 = pnand %p492_p3, %p658_p12  ;;  %p498_p10 = por %p497_p9, %p496_p8 }
  0x6c   : > { %p494_p7 = pneg %p493_p5 }
  0x6e   : > { %p499_p11 = pnand %p498_p10, %p494_p7 }
  0x70   : > { %502 = shalt.err (!%p499_p11)
}
  0x71   : > { %350 = dma.vmem_to_hbm [thread:$0]  (%p658_p12), %s250_s3, 128, %s252_s4, %s237_s5  }
  0x72 PF: > { %s263_s24 = sand.u32 1, %s550_s6   ;;  %p357_p4 = pnand %p333_p13, %p663_p0 }
  0x73   : > { %s264_s25 = scalar_lea.sflag [#allocation4], %s263_s24 }
  0x74   : > { %p358_p1 = pneg %p357_p4 }
  0x76   : > { %544 = dma.done.wait (%p358_p1), %s264_s25, 128  }
  0x77   : > { %546 = vsyncadd (%p358_p1), %s264_s25, 4294967168  ;;  %s17_s13 = sadd.s32 1, %s578_s13   ;;  %s766_s6 = smov %s554_s7 }
  0x78   : > { %p14_p6 = scmp.ge.s32.totalorder %s17_s13, 4   ;;  %s767_s7 = smov %s558_s8 }
  0x79   : > { %s768_s8 = smov %s652_s21  ;;  %s769_s9 = smov %s566_s10 }
  0x7a   : > { %s749_s10 = smov 0   ;;  %s770_s11 = smov %s574_s12 }
  0x7b   : > { %s771_s12 = smov %s773_s16  ;;  %16 = sbr.rel (!%p14_p6) target bundleno = 7 (0x7), region = 81 }
  0x80   :  { %270 = vsyncpa [#allocation3], 1 }
  0x81   :  { %272 = vsyncpa [#allocation3 + $0x1], 1 }
  0x82   :  { %273 = vsyncpa [#allocation4], 1 }
  0x83   :  { %275 = vsyncpa [#allocation4 + $0x1], 1 }

</bundles_post_ra>
